<compile_context>
chip_gen: v5e
topology: v5e:2x2
jax: 0.10.0
libtpu: 0.0.40
codegen_flags: <defaults>
</compile_context>

<pallas_src>
import jax
import jax.numpy as jnp
from jax.experimental import pallas as pl
from jax.experimental.pallas import tpu as pltpu


def _round_up(n, m):
    return ((n + m - 1) // m) * m


# -----------------------------------------------------------------------------
# Kernels
# -----------------------------------------------------------------------------
def _make_fused_kernel(low_precision_epilogue):
    """sigmoid(x @ W_fused + b_fused) for one batch tile (activation=None path)."""

    def kernel(x_ref, w_ref, b_ref, o_ref):
        # In-kernel cast of x to the MXU dtype (bf16 on the fast path): avoids a
        # separate XLA convert pass over x in HBM; the cast is a free VPU op here.
        x = x_ref[...].astype(w_ref.dtype)
        acc = jnp.dot(x, w_ref[...], preferred_element_type=jnp.float32)
        h = acc + b_ref[...]                        # f32 bias add
        if low_precision_epilogue:
            # bf16 sigmoid (v6e/v7x have bf16 VPU/EUP); halves vst traffic too.
            o_ref[...] = jax.nn.sigmoid(h.astype(o_ref.dtype))
        else:
            o_ref[...] = jax.nn.sigmoid(h).astype(o_ref.dtype)

    return kernel


def _make_mlp_kernel(act_fn, low_precision_epilogue):
    """3-matmul path, only needed when activation is not None."""

    def kernel(x_ref, w1_ref, b1_ref, w2_ref, b2_ref, w3_ref, b3_ref, o_ref):
        mxu = w1_ref.dtype
        h1 = jnp.dot(x_ref[...].astype(mxu), w1_ref[...],
                     preferred_element_type=jnp.float32) + b1_ref[...]
        h1 = act_fn(h1)
        h2 = jnp.dot(h1.astype(mxu), w2_ref[...],
                     preferred_element_type=jnp.float32) + b2_ref[...]
        h2 = act_fn(h2)
        h3 = jnp.dot(h2.astype(mxu), w3_ref[...],
                     preferred_element_type=jnp.float32) + b3_ref[...]
        if low_precision_epilogue:
            o_ref[...] = jax.nn.sigmoid(h3.astype(o_ref.dtype))
        else:
            o_ref[...] = jax.nn.sigmoid(h3).astype(o_ref.dtype)

    return kernel


# -----------------------------------------------------------------------------
# Batch-tiled pallas_call driver
# -----------------------------------------------------------------------------
def _choose_tb(B, block_b, min_steps=4):
    """Pick a batch tile: multiple of 8 sublanes, <= block_b rows, and (when B
    allows it) at least `min_steps` grid steps so the 'parallel' axis shards
    across both TensorCores on v7x and the in/out DMA pipeline can overlap."""
    steps = max(min_steps, pl.cdiv(B, block_b))
    tb = _round_up(max(1, pl.cdiv(B, steps)), 8)
    tb = max(8, min(tb, _round_up(block_b, 8)))
    return tb


def _batch_tiled_call(kernel, x, weight_args, out_dim, out_dtype, *, block_b):
    """Run `kernel` over a batch-tiled grid; weights/biases stay VMEM-resident.

    No wrapper-side padding or post-slice: the grid is cdiv(B, tb) and Pallas
    masks the trailing partial block's writeback, so the output is exactly
    (B, out_dim) in HBM with no extra copy passes.
    """
    B, K = x.shape
    tb = _choose_tb(B, block_b)
    grid = (pl.cdiv(B, tb),)

    x_spec = pl.BlockSpec((tb, K), lambda i: (i, 0))
    out_spec = pl.BlockSpec((tb, out_dim), lambda i: (i, 0))
    # Full-array weight/bias blocks with a constant index_map: DMA'd once and
    # reused every grid step (all weight_args are 2-D).
    w_specs = [pl.BlockSpec(a.shape, lambda i: (0, 0)) for a in weight_args]

    return pl.pallas_call(
        kernel,
        out_shape=jax.ShapeDtypeStruct((B, out_dim), out_dtype),
        grid_spec=pltpu.PrefetchScalarGridSpec(
            num_scalar_prefetch=0,
            grid=grid,
            in_specs=[x_spec] + w_specs,
            out_specs=out_spec,
        ),
        compiler_params=pltpu.CompilerParams(
            # Batch tiles are independent -> shard grid steps across TensorCores
            # (2 TCs on v7x) and double-buffer the x-in / out-writeback DMA.
            dimension_semantics=("parallel",),
        ),
    )(x, *weight_args)


# -----------------------------------------------------------------------------
# Public wrappers (match Vec2matEncoder.forward semantics, eval mode)
# -----------------------------------------------------------------------------
_ACTIVATIONS = {
    "relu": jax.nn.relu,
    "gelu": jax.nn.gelu,
    "tanh": jnp.tanh,
    "sigmoid": jax.nn.sigmoid,
    "silu": jax.nn.silu,
}


def fold_vec2mat_weights(w1, b1, w2, b2, w3, b3):
    """Fold the 3 affine layers (activation=None) into one (W_fused, b_fused).

    Exact up to f32 rounding.  Call once (or rely on jit constant-folding with
    constant weights) and feed the result to `vec2mat_encoder_fused`.
    """
    f32 = jnp.float32
    w_f = (w1.astype(f32) @ w2.astype(f32)) @ w3.astype(f32)
    b_f = ((b1.astype(f32) @ w2.astype(f32) + b2.astype(f32)) @ w3.astype(f32)
           + b3.astype(f32))
    return w_f, b_f


def vec2mat_encoder_fused(x, w_fused, b_fused, dim_input, dim_head, *,
                          use_bf16=True, out_dtype=jnp.bfloat16,
                          bf16_epilogue=True, block_b=2048):
    """activation=None fast path with pre-folded weights."""
    B = x.shape[0]
    dim_inner = dim_input * dim_head
    mxu_dtype = jnp.bfloat16 if use_bf16 else jnp.float32
    low_prec_epi = bool(bf16_epilogue) and jnp.dtype(out_dtype).itemsize < 4
    out_flat = _batch_tiled_call(
        _make_fused_kernel(low_prec_epi),
        x,                                           # cast to mxu dtype in-kernel
        [w_fused.astype(mxu_dtype), b_fused.astype(jnp.float32)],
        dim_inner, out_dtype, block_b=block_b,
    )
    # rearrange 'b (h w) -> b h w' with h = dim_input (free contiguous reshape).
    return out_flat.reshape(B, dim_input, dim_head)


def vec2mat_encoder(x, w1, b1, w2, b2, w3, b3, dim_input, dim_head,
                    activation=None, use_bf16=True, out_dtype=jnp.bfloat16,
                    bf16_epilogue=True, block_b=2048):
    """Forward pass of Vec2matEncoder.  Returns (B, dim_input, dim_head).

    out_dtype defaults to bf16 (sigmoid output in [0,1]; writeback dominates HBM
    bytes) -- pass out_dtype=jnp.float32 for exact f32 module semantics.
    On v5e pass bf16_epilogue=False (no bf16 VPU/EUP there).
    """
    B = x.shape[0]
    dim_inner = dim_input * dim_head
    f32 = jnp.float32

    if activation is None:
        w_f, b_f = fold_vec2mat_weights(w1, b1, w2, b2, w3, b3)
        return vec2mat_encoder_fused(
            x, w_f, b_f, dim_input, dim_head, use_bf16=use_bf16,
            out_dtype=out_dtype, bf16_epilogue=bf16_epilogue, block_b=block_b)

    if activation not in _ACTIVATIONS:
        raise ValueError(f"unsupported activation {activation!r}; "
                         f"expected one of {sorted(_ACTIVATIONS)}")
    act_fn = _ACTIVATIONS[activation]
    mxu_dtype = jnp.bfloat16 if use_bf16 else f32
    low_prec_epi = bool(bf16_epilogue) and jnp.dtype(out_dtype).itemsize < 4

    # Zero-pad the two intermediate widths up to lane-dense multiples of 128.
    # Exact: padded rows of w2 / w3 are zero, so padded columns of h1 / h2
    # contribute nothing regardless of the activation's value at 0.
    d1, d2 = w1.shape[1], w2.shape[1]
    d1p, d2p = _round_up(d1, 128), _round_up(d2, 128)
    w1p = jnp.pad(w1.astype(f32), ((0, 0), (0, d1p - d1)))
    b1p = jnp.pad(b1.astype(f32), ((0, 0), (0, d1p - d1)))
    w2p = jnp.pad(w2.astype(f32), ((0, d1p - d1), (0, d2p - d2)))
    b2p = jnp.pad(b2.astype(f32), ((0, 0), (0, d2p - d2)))
    w3p = jnp.pad(w3.astype(f32), ((0, d2p - d2), (0, 0)))

    out_flat = _batch_tiled_call(
        _make_mlp_kernel(act_fn, low_prec_epi),
        x,
        [w1p.astype(mxu_dtype), b1p,
         w2p.astype(mxu_dtype), b2p,
         w3p.astype(mxu_dtype), b3.astype(f32)],
        dim_inner, out_dtype, block_b=block_b,
    )
    return out_flat.reshape(B, dim_input, dim_head)


# -----------------------------------------------------------------------------
# Demo / correctness check
# -----------------------------------------------------------------------------
def init_linear(key, fan_in, fan_out):
    # Deterministic init mimicking nn.Linear's U(-1/sqrt(fan_in), 1/sqrt(fan_in)).
    kw, kb = jax.random.split(key)
    bound = 1.0 / (fan_in ** 0.5)
    w = jax.random.uniform(kw, (fan_in, fan_out), jnp.float32, -bound, bound)
    b = jax.random.uniform(kb, (1, fan_out), jnp.float32, -bound, bound)
    return w, b


if __name__ == "__main__":
    # Small shapes consistent with the module.
    B = 8
    dim_input = 32
    dim_head = 8
    dim_inner = dim_input * dim_head          # 256
    dim_inner1 = dim_inner // 4               # 64
    dim_inner2 = dim_inner // 2               # 128

    key = jax.random.PRNGKey(0)
    kx, k1, k2, k3 = jax.random.split(key, 4)

    x = jax.random.normal(kx, (B, dim_input), jnp.float32)
    w1, b1 = init_linear(k1, dim_input, dim_inner1)
    w2, b2 = init_linear(k2, dim_inner1, dim_inner2)
    w3, b3 = init_linear(k3, dim_inner2, dim_inner)

    # Pure-JAX f32 reference of the module forward (activation=None).
    ref = jax.nn.sigmoid(((x @ w1 + b1) @ w2 + b2) @ w3 + b3)
    ref = ref.reshape(B, dim_input, dim_head)

    # 1) default path: affine fold, bf16 MXU operands, bf16 output + epilogue.
    out = vec2mat_encoder(x, w1, b1, w2, b2, w3, b3, dim_input, dim_head)
    out = jax.block_until_ready(out)
    assert out.shape == (B, dim_input, dim_head)
    assert out.dtype == jnp.bfloat16
    err = float(jnp.max(jnp.abs(out.astype(jnp.float32) - ref)))
    assert err < 3e-2, err

    # 2) f32 everywhere (tight check of the folded algebra + masking path).
    out_f32 = vec2mat_encoder(x, w1, b1, w2, b2, w3, b3, dim_input, dim_head,
                              use_bf16=False, out_dtype=jnp.float32,
                              bf16_epilogue=False)
    out_f32 = jax.block_until_ready(out_f32)
    err = float(jnp.max(jnp.abs(out_f32 - ref)))
    assert jnp.allclose(out_f32, ref, atol=1e-4, rtol=1e-4), err

    # 3) odd batch size (exercises the masked trailing partial block: no pad,
    #    no post-slice in the wrapper).
    B_odd = 13
    x_odd = jax.random.normal(jax.random.PRNGKey(1), (B_odd, dim_input), jnp.float32)
    ref_odd = jax.nn.sigmoid(((x_odd @ w1 + b1) @ w2 + b2) @ w3 + b3)
    ref_odd = ref_odd.reshape(B_odd, dim_input, dim_head)
    out_odd = vec2mat_encoder(x_odd, w1, b1, w2, b2, w3, b3, dim_input, dim_head,
                              use_bf16=False, out_dtype=jnp.float32,
                              bf16_epilogue=False)
    out_odd = jax.block_until_ready(out_odd)
    assert out_odd.shape == (B_odd, dim_input, dim_head)
    err = float(jnp.max(jnp.abs(out_odd - ref_odd)))
    assert jnp.allclose(out_odd, ref_odd, atol=1e-4, rtol=1e-4), err

    # 4) 3-matmul kernel (activation != None): f32 tight check + bf16 fast path.
    ref_relu = jax.nn.sigmoid(
        jax.nn.relu(jax.nn.relu(x @ w1 + b1) @ w2 + b2) @ w3 + b3
    ).reshape(B, dim_input, dim_head)
    out_relu_f32 = vec2mat_encoder(x, w1, b1, w2, b2, w3, b3, dim_input, dim_head,
                                   activation="relu", use_bf16=False,
                                   out_dtype=jnp.float32, bf16_epilogue=False)
    out_relu_f32 = jax.block_until_ready(out_relu_f32)
    err = float(jnp.max(jnp.abs(out_relu_f32 - ref_relu)))
    assert jnp.allclose(out_relu_f32, ref_relu, atol=1e-4, rtol=1e-4), err

    out_relu = vec2mat_encoder(x, w1, b1, w2, b2, w3, b3, dim_input, dim_head,
                               activation="relu")
    out_relu = jax.block_until_ready(out_relu)
    err = float(jnp.max(jnp.abs(out_relu.astype(jnp.float32) - ref_relu)))
    assert err < 3e-2, err

    print("KERNEL_OK")
</pallas_src>

<mosaic_0001>
module attributes {stable_mosaic.version = 11 : i64} {
  func.func @kernel(%arg0: i32, %arg1: memref<8x32xf32, #tpu.memory_space<vmem>>, %arg2: memref<32x256xbf16, #tpu.memory_space<vmem>>, %arg3: memref<1x256xf32, #tpu.memory_space<vmem>>, %arg4: memref<8x256xbf16, #tpu.memory_space<vmem>>) attributes {dimension_semantics = [#tpu.dimension_semantics<parallel>], iteration_bounds = array<i64: 1>, scalar_prefetch = 0 : i64, scratch_operands = 0 : i64, tpu.core_type = #tpu.core_type<tc>, window_params = [{transform_indices = @transform_0, window_bounds = array<i64: 8, 32>}, {pipeline_mode = #tpu.pipeline_mode<synchronous>, transform_indices = @transform_1, window_bounds = array<i64: 32, 256>}, {pipeline_mode = #tpu.pipeline_mode<synchronous>, transform_indices = @transform_2, window_bounds = array<i64: 1, 256>}, {transform_indices = @transform_3, window_bounds = array<i64: 8, 256>}]} {
    %c0 = arith.constant 0 : index
    %c0_0 = arith.constant 0 : index
    %0 = vector.load %arg1[%c0, %c0_0] : memref<8x32xf32, #tpu.memory_space<vmem>>, vector<8x32xf32>
    %1 = arith.truncf %0 : vector<8x32xf32> to vector<8x32xbf16>
    %c0_1 = arith.constant 0 : index
    %c0_2 = arith.constant 0 : index
    %2 = vector.load %arg2[%c0_1, %c0_2] : memref<32x256xbf16, #tpu.memory_space<vmem>>, vector<32x256xbf16>
    %cst = arith.constant dense<0.000000e+00> : vector<8x256xf32>
    %3 = tpu.matmul %1, %2, %cst {dimension_numbers = #tpu.dot_dimension_numbers<[1], [0], [0], [1], [0, 0, 1, 1], [], []>} : vector<8x32xbf16>, vector<32x256xbf16>, vector<8x256xf32> -> vector<8x256xf32>
    %c0_3 = arith.constant 0 : index
    %c0_4 = arith.constant 0 : index
    %4 = vector.load %arg3[%c0_3, %c0_4] : memref<1x256xf32, #tpu.memory_space<vmem>>, vector<1x256xf32>
    %5 = vector.broadcast %4 : vector<1x256xf32> to vector<8x256xf32>
    %6 = arith.addf %3, %5 : vector<8x256xf32>
    %7 = arith.truncf %6 : vector<8x256xf32> to vector<8x256xbf16>
    %8 = arith.negf %7 : vector<8x256xbf16>
    %9 = math.exp %8 : vector<8x256xbf16>
    %cst_5 = arith.constant 1.000000e+00 : bf16
    %10 = vector.broadcast %cst_5 : bf16 to vector<8x256xbf16>
    %11 = arith.addf %10, %9 : vector<8x256xbf16>
    %12 = arith.divf %10, %11 : vector<8x256xbf16>
    %c0_6 = arith.constant 0 : index
    %c0_7 = arith.constant 0 : index
    %13 = vector.load %arg4[%c0_6, %c0_7] : memref<8x256xbf16, #tpu.memory_space<vmem>>, vector<8x256xbf16>
    tpu.vector_store %arg4[%c0_6, %c0_7], %12 {strides = array<i32>} : memref<8x256xbf16, #tpu.memory_space<vmem>>, vector<8x256xbf16>,
    return
  }
  func.func @transform_0(%arg0: i32) -> (i32, i32) {
    %c0_i32 = arith.constant 0 : i32
    %c0_i32_0 = arith.constant 0 : i32
    return %arg0, %c0_i32 : i32, i32
  }
  func.func @transform_1(%arg0: i32) -> (i32, i32) {
    %c0_i32 = arith.constant 0 : i32
    %c0_i32_0 = arith.constant 0 : i32
    %c0_i32_1 = arith.constant 0 : i32
    return %c0_i32, %c0_i32_0 : i32, i32
  }
  func.func @transform_2(%arg0: i32) -> (i32, i32) {
    %c0_i32 = arith.constant 0 : i32
    %c0_i32_0 = arith.constant 0 : i32
    %c0_i32_1 = arith.constant 0 : i32
    return %c0_i32, %c0_i32_0 : i32, i32
  }
  func.func @transform_3(%arg0: i32) -> (i32, i32) {
    %c0_i32 = arith.constant 0 : i32
    %c0_i32_0 = arith.constant 0 : i32
    return %arg0, %c0_i32 : i32, i32
  }
}

</mosaic_0001>

<bundles_post_ra>
// kernel: tpu_custom_call.1
= control target key start
LH: loop header
LB: loop body
LE: loop exit
PB: predicated region body
PF: predicated region fallthrough
CT: control target
= control target key end

     0   :  { %8 = vsyncpa [#allocation3], 0  ;;  %s342_s0 = inlined_call_operand.hbm [shape: f32[8,32], index: 0, kind: input, shape index: {}]   ;;  %s343_s1 = inlined_call_operand.hbm [shape: bf16[32,256], index: 1, kind: input, shape index: {}]   ;;  %s344_s2 = inlined_call_operand.hbm [shape: f32[1,256], index: 2, kind: input, shape index: {}]   ;;  %s345_s3 = inlined_call_operand.hbm [shape: bf16[8,256], index: 3, kind: output, shape index: {}]  }
   0x1   :  { %9 = vsyncpa [#allocation6], 0  ;;  %s26_s14 = sshll.u32 %s343_s1, 4  ;;  %s27_s14 = int_to_ptr.hbm [resolvable:$true] %s26_s14 }
   0x2   :  { %10 = vsyncpa [#allocation4], 0  ;;  %s303_s15 = smov [#allocation5]   ;;  %s16_s19 = sshll.u32 %s342_s0, 4  ;;  %s17_s19 = int_to_ptr.hbm [resolvable:$true] %s16_s19 }
   0x3   :  { %s28_s16 = sshll.u32 %s303_s15, 4  ;;  %s304_s20 = smov 128   ;;  %s29_s16 = int_to_ptr.vmem [resolvable:$true] %s28_s16 }
   0x4   :  { %s305_s21 = smov 8   ;;  %s306_s22 = smov [#allocation2]  }
   0x5   :  { %34 = dma.hbm_to_vmem [thread:$0]  %s27_s14, 512, %s29_s16, [#allocation6], %s304_s20, %s304_s20, %s305_s21  }
   0x6   :  { %s18_s23 = sshll.u32 %s306_s22, 4  ;;  %s40_s26 = sshll.u32 %s344_s2, 4  ;;  %s19_s23 = int_to_ptr.vmem [resolvable:$true] %s18_s23  ;;  %s41_s26 = int_to_ptr.hbm [resolvable:$true] %s40_s26 }
   0x7   :  { %21 = dma.hbm_to_vmem [thread:$0]  %s17_s19, 128, %s19_s23, [#allocation3]  }
   0x8   :  { %s307_s1 = smov [#allocation7]  }
   0x9   :  { %s42_s27 = sshll.u32 %s307_s1, 4  ;;  %s43_s27 = int_to_ptr.vmem [resolvable:$true] %s42_s27 }
   0xa   :  { %45 = dma.hbm_to_vmem [thread:$0]  %s41_s26, 32, %s43_s27, [#allocation6]  }
   0xb   :  { %297 = dma.done.wait [#allocation3], 128  }
   0xc   :  { %298 = vsyncadd [#allocation3], 4294967168 }
   0xd   :  { %299 = dma.done.wait [#allocation6], 544  }
   0xe   :  { %300 = vsyncadd [#allocation6], 4294966752  ;;  %v174_v0 = vld [vmem:[#allocation5 + $0x10] sm:$0xf]  ;;  %v185_v1 = vld [vmem:[#allocation5 + $0x14] sm:$0xf0] }
   0xf   :  { %v184_v2 = vld [vmem:[#allocation5 + $0x14] sm:$0xf]  ;;  %v175_v3 = vor.u32 %v185_v1, %v174_v0  ;;  %v176_v4 = vld [vmem:[#allocation5 + $0x18] sm:$0xf0]  ;;  %v166_v5 = vld [vmem:[#allocation5] sm:$0xf] }
  0x10   :  { %v183_v6 = vld [vmem:[#allocation5 + $0x4] sm:$0xf0]  ;;  %v179_v7 = vor.u32 %v184_v2, %v176_v4  ;;  %v182_v8 = vld [vmem:[#allocation5 + $0x4] sm:$0xf]  ;;  %v168_v9 = vld [vmem:[#allocation5 + $0x8] sm:$0xf0] }
  0x11   :  { %102 = vmatpush.bf16.msra.mxu0 %v175_v3  ;;  %v167_v10 = vor.u32 %v183_v6, %v166_v5  ;;  %v60_v11 = vld [vmem:[#allocation2] sm:$0xff]  ;;  %v171_v12 = vor.u32 %v182_v8, %v168_v9  ;;  %vm92_vm0 = vcmask 261120   ;;  %v66_v14 = vld [vmem:[#allocation7] sm:$0x3]  ;;  %v308_v39 = vmov 1065369472  }
  0x12   :  { %115 = vmatpush.bf16.msra.mxu1 %v179_v7  ;;  %v61_v13 = vpack.c.bf16 %v60_v11, %v60_v11  ;;  %v68_v15 = vperm.slane %v66_v14, 0  ;;  %v69_v16 = vperm.slane %v66_v14, 1  ;;  %v136_v40 = vunpack.c.h.bf16 %v308_v39  ;;  %s309_s0 = smov [#allocation8]   ;;  %s153_s30 = sshll.u32 %s345_s3, 4  ;;  %s154_s30 = int_to_ptr.hbm [resolvable:$true] %s153_s30 }
  0x13   :  { %v137_v41 = vunpack.c.l.bf16 %v308_v39  ;;  %s151_s2 = sshll.u32 %s309_s0, 4  ;;  %s152_s2 = int_to_ptr.vmem [resolvable:$true] %s151_s2 }
  0x15   :  { %103 = vmatpush.bf16.msra.mxu0 %v167_v10 }
  0x16   :  { %116 = vmatpush.bf16.msra.mxu1 %v171_v12 }
  0x18   :  { %180 = vmatmul.msk.bf16.vlgmr.msra.gmra.mxu0 %vm92_vm0, %v61_v13 }
  0x19   :  { %181 = vmatmul.msk.bf16.vlgmr.msra.gmra.mxu1 %vm92_vm0, %v61_v13 }
  0x95   :  { %v105_v17 = vpop.f32.mrf.mxu0 }
  0x96   :  { %v106_v18 = vadd.f32 %v105_v17, %v68_v15  ;;  %v118_v19 = vpop.f32.mrf.mxu1 }
  0x97   :  { %v119_v20 = vadd.f32 %v118_v19, %v69_v16 }
  0x99   :  { %v122_v21 = vpack.c.bf16 %v119_v20, %v106_v18 }
  0x9b   :  { %v123_v22 = vxor.u32 2147516416, %v122_v21 }
  0x9d   :  { %v124_v23 = vunpack.c.l.bf16 %v123_v22  ;;  %v125_v24 = vunpack.c.h.bf16 %v123_v22  ;;  %v107_v25 = vpop.f32.mrf.mxu0 }
  0x9e   :  { %v120_v26 = vpop.f32.mrf.mxu1 }
  0x9f   :  { %v126_v27 = vmul.f32 1.442695, %v124_v23  ;;  %v128_v28 = vmul.f32 1.442695, %v125_v24 }
  0xa1   :  { %193 = vpow2.f32 %v126_v27 }
  0xa2   :  { %195 = vpow2.f32 %v128_v28 }
  0xa7   :  { %v194_v29 = vpop.eup %193 }
  0xa8   :  { %v196_v30 = vpop.eup %195 }
  0xa9   :  { %v130_v31 = vpack.c.bf16 %v196_v30, %v194_v29 }
  0xab   :  { %v131_v32 = vunpack.c.l.bf16 %v130_v31  ;;  %v132_v33 = vunpack.c.h.bf16 %v130_v31 }
  0xad   :  { %v133_v34 = vadd.f32 1.0, %v131_v32  ;;  %v134_v35 = vadd.f32 1.0, %v132_v33 }
  0xaf   :  { %v135_v36 = vpack.c.bf16 %v134_v35, %v133_v34 }
  0xb1   :  { %v138_v37 = vunpack.c.h.bf16 %v135_v36  ;;  %v139_v38 = vunpack.c.l.bf16 %v135_v36 }
  0xb3   :  { %197 = vrcp.f32 %v138_v37 }
  0xb4   :  { %199 = vrcp.f32 %v139_v38 }
  0xb9   :  { %v198_v42 = vpop.eup %197 }
  0xba   :  { %v200_v43 = vpop.eup %199  ;;  %v141_v44 = vmul.f32 %v198_v42, %v136_v40 }
  0xbb   :  { %v143_v45 = vmul.f32 %v200_v43, %v137_v41 }
  0xbd   :  { %v144_v46 = vpack.c.bf16 %v141_v44, %v143_v45 }
  0xbf   :  { %145 = vst [vmem:[#allocation8] sm:$0xff] %v144_v46 }
  0xc0   :  { %156 = dma.vmem_to_hbm [thread:$0]  %s152_s2, 128, %s154_s30, [#allocation4]  }
  0xc1   :  { %301 = dma.done.wait [#allocation4], 128  }
  0xc2   :  { %302 = vsyncadd [#allocation4], 4294967168 }
  0xc3   :  { %161 = vsyncpa [#allocation3], 1 }
  0xc4   :  { %162 = vsyncpa [#allocation6], 1 }
  0xc5   :  { %163 = vsyncpa [#allocation4], 1 }

</bundles_post_ra>
